<compile_context>
chip_gen: v5e
topology: v5e:2x2
jax: 0.10.0
libtpu: 0.0.40
codegen_flags: <defaults>
</compile_context>

<pallas_src>
import jax
import jax.numpy as jnp
from jax.experimental import pallas as pl
from jax.experimental.pallas import tpu as pltpu


def layer_kernel(x_ref, w_ref, gb_ref, o_ref):
    # Dropout: identity (dropout_p=None in the module construction).
    x = x_ref[...]

    # Linear (bias omitted: exactly cancelled by the BN mean subtraction below).
    # Operands may be bf16; accumulation is forced to f32 on the MXU.
    y = jnp.dot(x, w_ref[...], preferred_element_type=jnp.float32)

    # BatchNorm1d (training mode), single-pass statistics over the batch:
    #   mean = E[y], var = max(E[y^2] - mean^2, 0)   (biased var, eps = 1e-5)
    inv_b = 1.0 / y.shape[0]
    mean = jnp.sum(y, axis=0, keepdims=True) * inv_b
    ex2 = jnp.sum(y * y, axis=0, keepdims=True) * inv_b
    var = jnp.maximum(ex2 - mean * mean, 0.0)  # clamp: guard cancellation

    # Fold gamma into the inverse std (rsqrt runs on the EUP slot, ~free) and
    # fuse the mean subtraction into a single shift: y*scale + shift.
    gamma = gb_ref[0:1, :]
    beta = gb_ref[1:2, :]
    scale = gamma * jax.lax.rsqrt(var + 1e-5)
    shift = beta - scale * mean
    y = y * scale + shift

    # LeakyReLU (negative_slope = 0.01) as a single vmax.
    o_ref[...] = jnp.maximum(y, 0.01 * y).astype(o_ref.dtype)


def layer_forward(x, w, gamma, beta, *, tn=256, compute_dtype=jnp.bfloat16):
    """x: [B, in_features]; w: [in_features, out_features] (pre-transposed W^T);
    gamma/beta: [1, out_features]. Returns [B, out_features] float32.

    compute_dtype is the streaming dtype for x and w (bf16 recommended on
    v6e/v7x; accumulation is always f32)."""
    B, K = x.shape
    Kw, N = w.shape
    assert Kw == K

    # --- Pad the contraction dim K to a multiple of 128 (zero pad: exact). ---
    k_pad = pl.cdiv(K, 128) * 128
    if k_pad != K:
        x = jnp.pad(x, ((0, 0), (0, k_pad - K)))
        w = jnp.pad(w, ((0, k_pad - K), (0, 0)))

    # --- Feature-dim tiling. Tiny layers: one full-extent block (no dead work).
    #     Larger layers: lane-dense multiple of tn, sliced back after the call.
    #     Padded feature columns give y == 0 -> mean 0, var 0, finite rsqrt,
    #     gamma/beta padded 0 -> output 0; real-column statistics untouched. ---
    if N <= tn:
        n_pad, blk_n, grid_n = N, N, 1
    else:
        n_pad = pl.cdiv(N, tn) * tn
        blk_n, grid_n = tn, n_pad // tn
        if n_pad != N:
            w = jnp.pad(w, ((0, 0), (0, n_pad - N)))
            gamma = jnp.pad(gamma, ((0, 0), (0, n_pad - N)))
            beta = jnp.pad(beta, ((0, 0), (0, n_pad - N)))

    # --- bf16 (or f32) streaming of the dominant operands. ---
    x = x.astype(compute_dtype)
    w = w.astype(compute_dtype)

    # Pack per-feature vectors into one [2, n_pad] f32 operand (single DMA tile).
    gb = jnp.concatenate([gamma, beta], axis=0).astype(jnp.float32)

    # --- Explicit VMEM budget: resident x + double-buffered w/gb/out tiles,
    #     with headroom.  Keeps v5e (16 MiB scoped default) from shrinking
    #     windows and stays well inside v7x's 64 MiB physical VMEM. ---
    itemsize = jnp.dtype(compute_dtype).itemsize
    vmem_bytes = (
        2 * B * k_pad * itemsize        # x (pipelined buffers)
        + 2 * k_pad * blk_n * itemsize  # w tiles
        + 2 * 2 * blk_n * 4             # gamma/beta tiles
        + 2 * B * blk_n * 4             # out tiles
    )
    vmem_limit = min(max(2 * vmem_bytes + (4 << 20), 16 << 20), 100 << 20)

    out = pl.pallas_call(
        layer_kernel,
        out_shape=jax.ShapeDtypeStruct((B, n_pad), jnp.float32),
        grid=(grid_n,),
        in_specs=[
            pl.BlockSpec((B, k_pad), lambda j: (0, 0)),    # full batch resident
            pl.BlockSpec((k_pad, blk_n), lambda j: (0, j)),  # weight stream over N
            pl.BlockSpec((2, blk_n), lambda j: (0, j)),      # packed gamma/beta
        ],
        out_specs=pl.BlockSpec((B, blk_n), lambda j: (0, j)),
        compiler_params=pltpu.CompilerParams(
            dimension_semantics=("parallel",),  # N-tiles independent (per-feature BN)
            vmem_limit_bytes=vmem_limit,
        ),
    )(x, w, gb)

    return out[:, :N] if n_pad != N else out


if __name__ == "__main__":
    # Small, module-consistent shapes: batch=8, in_features=32, out_features=32.
    B, in_features, out_features = 8, 32, 32

    key = jax.random.PRNGKey(0)
    k_x, k_w, k_b = jax.random.split(key, 3)

    x = jax.random.normal(k_x, (B, in_features), dtype=jnp.float32)

    # nn.Linear-style init; weight stored as W^T ([in, out]) for a plain x @ W matmul.
    bound = 1.0 / (in_features ** 0.5)
    w = jax.random.uniform(
        k_w, (in_features, out_features), minval=-bound, maxval=bound, dtype=jnp.float32
    )
    b = jax.random.uniform(
        k_b, (1, out_features), minval=-bound, maxval=bound, dtype=jnp.float32
    )

    # BatchNorm1d affine params: default init weight=1, bias=0.
    gamma = jnp.ones((1, out_features), dtype=jnp.float32)
    beta = jnp.zeros((1, out_features), dtype=jnp.float32)

    # Pure-JAX reference KEEPS the linear bias and uses two-pass stats (full
    # module semantics); the kernel omits the bias (cancelled by BN) and uses
    # one-pass stats.
    y_ref = x @ w + b
    mean = jnp.mean(y_ref, axis=0, keepdims=True)
    var = jnp.mean((y_ref - mean) ** 2, axis=0, keepdims=True)
    y_ref = (y_ref - mean) / jnp.sqrt(var + 1e-5) * gamma + beta
    y_ref = jnp.where(y_ref >= 0.0, y_ref, 0.01 * y_ref)

    # 1) f32 streaming path: bit-level semantics check (tight tolerance).
    out_f32 = layer_forward(x, w, gamma, beta, compute_dtype=jnp.float32)
    jax.block_until_ready(out_f32)
    assert jnp.allclose(out_f32, y_ref, atol=1e-4, rtol=1e-4), (
        float(jnp.max(jnp.abs(out_f32 - y_ref)))
    )

    # 2) bf16 streaming path (default, memory-roofline optimized): looser tolerance.
    out_bf16 = layer_forward(x, w, gamma, beta, compute_dtype=jnp.bfloat16)
    jax.block_until_ready(out_bf16)
    assert jnp.allclose(out_bf16, y_ref, atol=6e-2, rtol=6e-2), (
        float(jnp.max(jnp.abs(out_bf16 - y_ref)))
    )

    print("KERNEL_OK")
</pallas_src>

<mosaic_0001>
module attributes {stable_mosaic.version = 11 : i64} {
  func.func @layer_kernel(%arg0: i32, %arg1: memref<8x128xf32, #tpu.memory_space<vmem>>, %arg2: memref<128x32xf32, #tpu.memory_space<vmem>>, %arg3: memref<2x32xf32, #tpu.memory_space<vmem>>, %arg4: memref<8x32xf32, #tpu.memory_space<vmem>>) attributes {dimension_semantics = [#tpu.dimension_semantics<parallel>], iteration_bounds = array<i64: 1>, scalar_prefetch = 0 : i64, scratch_operands = 0 : i64, tpu.core_type = #tpu.core_type<tc>, window_params = [{pipeline_mode = #tpu.pipeline_mode<synchronous>, transform_indices = @transform_0, window_bounds = array<i64: 8, 128>}, {transform_indices = @transform_1, window_bounds = array<i64: 128, 32>}, {transform_indices = @transform_2, window_bounds = array<i64: 2, 32>}, {transform_indices = @transform_3, window_bounds = array<i64: 8, 32>}]} {
    %c0 = arith.constant 0 : index
    %c0_0 = arith.constant 0 : index
    %0 = vector.load %arg1[%c0, %c0_0] : memref<8x128xf32, #tpu.memory_space<vmem>>, vector<8x128xf32>
    %c0_1 = arith.constant 0 : index
    %c0_2 = arith.constant 0 : index
    %1 = vector.load %arg2[%c0_1, %c0_2] : memref<128x32xf32, #tpu.memory_space<vmem>>, vector<128x32xf32>
    %cst = arith.constant dense<0.000000e+00> : vector<8x32xf32>
    %2 = tpu.matmul %0, %1, %cst {dimension_numbers = #tpu.dot_dimension_numbers<[1], [0], [0], [1], [0, 0, 1, 1], [], []>} : vector<8x128xf32>, vector<128x32xf32>, vector<8x32xf32> -> vector<8x32xf32>
    %cst_3 = arith.constant dense<0.000000e+00> : vector<32xf32>
    %3 = vector.multi_reduction <add>, %2, %cst_3 [0] : vector<8x32xf32> to vector<32xf32>
    %4 = vector.shape_cast %3 : vector<32xf32> to vector<1x32xf32>
    %cst_4 = arith.constant 1.250000e-01 : f32
    %5 = vector.broadcast %cst_4 : f32 to vector<1x32xf32>
    %6 = arith.mulf %4, %5 : vector<1x32xf32>
    %7 = arith.mulf %2, %2 : vector<8x32xf32>
    %cst_5 = arith.constant dense<0.000000e+00> : vector<32xf32>
    %8 = vector.multi_reduction <add>, %7, %cst_5 [0] : vector<8x32xf32> to vector<32xf32>
    %9 = vector.shape_cast %8 : vector<32xf32> to vector<1x32xf32>
    %cst_6 = arith.constant 1.250000e-01 : f32
    %10 = vector.broadcast %cst_6 : f32 to vector<1x32xf32>
    %11 = arith.mulf %9, %10 : vector<1x32xf32>
    %12 = arith.mulf %6, %6 : vector<1x32xf32>
    %13 = arith.subf %11, %12 : vector<1x32xf32>
    %cst_7 = arith.constant 0.000000e+00 : f32
    %14 = vector.broadcast %cst_7 : f32 to vector<1x32xf32>
    %15 = arith.maximumf %13, %14 : vector<1x32xf32>
    %c0_8 = arith.constant 0 : index
    %c0_9 = arith.constant 0 : index
    %16 = vector.load %arg3[%c0_8, %c0_9] : memref<2x32xf32, #tpu.memory_space<vmem>>, vector<1x32xf32>
    %c1 = arith.constant 1 : index
    %c0_10 = arith.constant 0 : index
    %17 = vector.load %arg3[%c1, %c0_10] : memref<2x32xf32, #tpu.memory_space<vmem>>, vector<1x32xf32>
    %cst_11 = arith.constant 9.99999974E-6 : f32
    %18 = vector.broadcast %cst_11 : f32 to vector<1x32xf32>
    %19 = arith.addf %15, %18 : vector<1x32xf32>
    %20 = math.rsqrt %19 : vector<1x32xf32>
    %21 = arith.mulf %16, %20 : vector<1x32xf32>
    %22 = arith.mulf %21, %6 : vector<1x32xf32>
    %23 = arith.subf %17, %22 : vector<1x32xf32>
    %24 = vector.broadcast %21 : vector<1x32xf32> to vector<8x32xf32>
    %25 = arith.mulf %2, %24 : vector<8x32xf32>
    %26 = vector.broadcast %23 : vector<1x32xf32> to vector<8x32xf32>
    %27 = arith.addf %25, %26 : vector<8x32xf32>
    %cst_12 = arith.constant 0.00999999977 : f32
    %28 = vector.broadcast %cst_12 : f32 to vector<8x32xf32>
    %29 = arith.mulf %28, %27 : vector<8x32xf32>
    %30 = arith.maximumf %27, %29 : vector<8x32xf32>
    %c0_13 = arith.constant 0 : index
    %c0_14 = arith.constant 0 : index
    %31 = vector.load %arg4[%c0_13, %c0_14] : memref<8x32xf32, #tpu.memory_space<vmem>>, vector<8x32xf32>
    tpu.vector_store %arg4[%c0_13, %c0_14], %30 {strides = array<i32>} : memref<8x32xf32, #tpu.memory_space<vmem>>, vector<8x32xf32>,
    return
  }
  func.func @transform_0(%arg0: i32) -> (i32, i32) {
    %c0_i32 = arith.constant 0 : i32
    %c0_i32_0 = arith.constant 0 : i32
    %c0_i32_1 = arith.constant 0 : i32
    return %c0_i32, %c0_i32_0 : i32, i32
  }
  func.func @transform_1(%arg0: i32) -> (i32, i32) {
    %c0_i32 = arith.constant 0 : i32
    %c0_i32_0 = arith.constant 0 : i32
    return %c0_i32, %arg0 : i32, i32
  }
  func.func @transform_2(%arg0: i32) -> (i32, i32) {
    %c0_i32 = arith.constant 0 : i32
    %c0_i32_0 = arith.constant 0 : i32
    return %c0_i32, %arg0 : i32, i32
  }
  func.func @transform_3(%arg0: i32) -> (i32, i32) {
    %c0_i32 = arith.constant 0 : i32
    %c0_i32_0 = arith.constant 0 : i32
    return %c0_i32, %arg0 : i32, i32
  }
}

</mosaic_0001>

<bundles_post_ra>
// kernel: tpu_custom_call.1
= control target key start
LH: loop header
LB: loop body
LE: loop exit
PB: predicated region body
PF: predicated region fallthrough
CT: control target
= control target key end

     0   :  { %s225_s0 = inlined_call_operand.vmem [shape: f32[8,128], index: 0, kind: input, shape index: {}]   ;;  %s226_s1 = inlined_call_operand.vmem [shape: f32[128,32], index: 1, kind: input, shape index: {}]   ;;  %s227_s2 = inlined_call_operand.vmem [shape: f32[2,32], index: 2, kind: input, shape index: {}]   ;;  %s228_s3 = inlined_call_operand.hbm [shape: f32[8,32], index: 3, kind: output, shape index: {}]  }
   0x1   :  { %v31_v0 = vld [vmem:[%s226_s1 + $0x78] sm:$0xff]  ;;  %v30_v1 = vld [vmem:[%s226_s1 + $0x70] sm:$0xff]  ;;  %v29_v2 = vld [vmem:[%s226_s1 + $0x68] sm:$0xff] }
   0x2   :  { %32 = vmatpush.msra.mxu0 %v31_v0  ;;  %v28_v3 = vld [vmem:[%s226_s1 + $0x60] sm:$0xff] }
   0x4   :  { %33 = vmatpush.msra.mxu0 %v30_v1 }
   0x6   :  { %34 = vmatpush.msra.mxu0 %v29_v2 }
   0x7   :  { %8 = vsyncpa [#allocation3], 0  ;;  %v27_v4 = vld [vmem:[%s226_s1 + $0x58] sm:$0xff]  ;;  %v26_v5 = vld [vmem:[%s226_s1 + $0x50] sm:$0xff]  ;;  %vm52_vm0 = vcmask 261120   ;;  %s141_s21 = smov [#allocation2]  }
   0x8   :  { %35 = vmatpush.msra.mxu0 %v28_v3  ;;  %v25_v6 = vld [vmem:[%s226_s1 + $0x48] sm:$0xff]  ;;  %v24_v7 = vld [vmem:[%s226_s1 + $0x40] sm:$0xff]  ;;  %v23_v8 = vld [vmem:[%s226_s1 + $0x38] sm:$0xff]  ;;  %s101_s22 = sshll.u32 %s141_s21, 4  ;;  %s103_s25 = sshll.u32 %s228_s3, 4  ;;  %s102_s22 = int_to_ptr.vmem [resolvable:$true] %s101_s22  ;;  %s104_s25 = int_to_ptr.hbm [resolvable:$true] %s103_s25 }
   0x9   :  { %v22_v9 = vld [vmem:[%s226_s1 + $0x30] sm:$0xff]  ;;  %v21_v10 = vld [vmem:[%s226_s1 + $0x28] sm:$0xff]  ;;  %v20_v11 = vld [vmem:[%s226_s1 + $0x20] sm:$0xff] }
   0xa   :  { %36 = vmatpush.msra.mxu0 %v27_v4  ;;  %v19_v12 = vld [vmem:[%s226_s1 + $0x18] sm:$0xff]  ;;  %v18_v13 = vld [vmem:[%s226_s1 + $0x10] sm:$0xff]  ;;  %v17_v14 = vld [vmem:[%s226_s1 + $0x8] sm:$0xff] }
   0xb   :  { %v16_v15 = vld [vmem:[%s226_s1] sm:$0xff] }
   0xc   :  { %37 = vmatpush.msra.mxu0 %v26_v5  ;;  %v15_v16 = vld [vmem:[%s225_s0] sm:$0xff] }
   0xd   :  { %v73_v44 = vld [vmem:[%s227_s2] sm:$0x1]  ;;  %v74_v48 = vld [vmem:[%s227_s2 + $0x1] sm:$0x1] }
   0xe   :  { %38 = vmatpush.msra.mxu0 %v25_v6 }
  0x10   :  { %39 = vmatpush.msra.mxu0 %v24_v7 }
  0x12   :  { %40 = vmatpush.msra.mxu0 %v23_v8 }
  0x14   :  { %41 = vmatpush.msra.mxu0 %v22_v9 }
  0x16   :  { %42 = vmatpush.msra.mxu0 %v21_v10 }
  0x18   :  { %43 = vmatpush.msra.mxu0 %v20_v11 }
  0x1a   :  { %44 = vmatpush.msra.mxu0 %v19_v12 }
  0x1c   :  { %45 = vmatpush.msra.mxu0 %v18_v13 }
  0x1e   :  { %46 = vmatpush.msra.mxu0 %v17_v14 }
  0x20   :  { %47 = vmatpush.msra.mxu0 %v16_v15 }
  0x21   :  { %48 = vmatmul.f32.vlgmr.msra.gmra.mxu0 %v15_v16 }
  0x9e   :  { %v49_v17 = vpop.f32.mrf.mxu0 }
  0x9f   :  { %v53_v18 = vsel %vm52_vm0, %v49_v17, 0.0  ;;  %v61_v19 = vmul.f32 %v49_v17, %v49_v17 }
  0xa0   :  { %v54_v20 = vrot.slane %v53_v18, 4 }
  0xa1   :  { %v62_v21 = vsel %vm52_vm0, %v61_v19, 0.0 }
  0xa2   :  { %v55_v22 = vadd.f32 %v54_v20, %v53_v18  ;;  %v63_v23 = vrot.slane %v62_v21, 4 }
  0xa4   :  { %v56_v24 = vrot.slane %v55_v22, 2  ;;  %v64_v25 = vadd.f32 %v63_v23, %v62_v21 }
  0xa6   :  { %v57_v26 = vadd.f32 %v56_v24, %v55_v22  ;;  %v65_v27 = vrot.slane %v64_v25, 2 }
  0xa8   :  { %v58_v28 = vrot.slane %v57_v26, 1  ;;  %v66_v29 = vadd.f32 %v65_v27, %v64_v25 }
  0xaa   :  { %v59_v30 = vadd.f32 %v58_v28, %v57_v26  ;;  %v67_v31 = vrot.slane %v66_v29, 1 }
  0xac   :  { %v60_v32 = vmul.f32 0.125, %v59_v30  ;;  %v68_v33 = vadd.f32 %v67_v31, %v66_v29 }
  0xae   :  { %v69_v34 = vmul.f32 0.125, %v68_v33  ;;  %v70_v35 = vmul.f32 %v60_v32, %v60_v32 }
  0xb0   :  { %v71_v36 = vsub.f32 %v69_v34, %v70_v35 }
  0xb2   :  { %v72_v37 = vmax.f32 %v71_v36, 0.0 }
  0xb4   :  { %v75_v38 = vadd.f32 1e-05, %v72_v37 }
  0xb6   :  { %113 = vrsqrt.f32 %v75_v38  ;;  %vm82_vm2 = vweird.f32 %v75_v38 }
  0xbc   :  { %v114_v39 = vpop.eup %113 }
  0xbd   :  { %v77_v40 = vmul.f32 %v114_v39, %v75_v38  ;;  %vm83_vm1 = vweird.f32 %v114_v39 }
  0xbe   :  { %vm84_vm3 = vmor %vm82_vm2, %vm83_vm1 }
  0xbf   :  { %v78_v41 = vmul.f32 %v114_v39, %v77_v40 }
  0xc1   :  { %v79_v42 = vmul.f32 0.5, %v78_v41 }
  0xc3   :  { %v80_v43 = vsub.f32 1.5, %v79_v42 }
  0xc5   :  { %v81_v45 = vmul.f32 %v114_v39, %v80_v43 }
  0xc7   :  { %v85_v46 = vsel %vm84_vm3, %v114_v39, %v81_v45 }
  0xc8   :  { %v86_v47 = vmul.f32 %v85_v46, %v73_v44 }
  0xca   :  { %v87_v49 = vmul.f32 %v86_v47, %v60_v32  ;;  %v89_v50 = vperm.slane %v86_v47, 0 }
  0xcc   :  { %v88_v51 = vsub.f32 %v74_v48, %v87_v49  ;;  %v90_v52 = vmul.f32 %v89_v50, %v49_v17 }
  0xce   :  { %v91_v53 = vperm.slane %v88_v51, 0 }
  0xd0   :  { %v92_v54 = vadd.f32 %v91_v53, %v90_v52 }
  0xd2   :  { %v93_v55 = vmul.f32 0.01, %v92_v54 }
  0xd4   :  { %v94_v56 = vmax.f32 %v92_v54, %v93_v55 }
  0xd6   :  { %95 = vst.msk [vmem:[#allocation2] sm:$0xff] %vm52_vm0, %v94_v56 }
  0xd7   :  { %106 = dma.vmem_to_hbm [thread:$0]  %s102_s22, 128, %s104_s25, [#allocation3]  }
  0xd8   :  { %139 = dma.done.wait [#allocation3], 128  }
  0xd9   :  { %140 = vsyncadd [#allocation3], 4294967168 }
  0xda   :  { %111 = vsyncpa [#allocation3], 1 }

</bundles_post_ra>
